<compile_context>
chip_gen: v7x
topology: tpu7x:2x2x1
jax: 0.10.0
libtpu: 0.0.40
codegen_flags: <defaults>
</compile_context>

<pallas_src>
import functools

import jax
import jax.numpy as jnp
from jax.experimental import pallas as pl
from jax.experimental.pallas import tpu as pltpu

EPS = 1e-5                         # torch.nn.LayerNorm default eps
MXU_DTYPE = jnp.bfloat16           # weight / matmul feed dtype (f32 accumulation).
                                   # NOTE: bf16 weights differ numerically from the f32
                                   # PyTorch module; ref_forward uses the same numerics.
MXU_BYTES = jnp.dtype(MXU_DTYPE).itemsize


def _round_up(x, m):
    return (x + m - 1) // m * m


def _layer_norm(x, gamma, beta):
    mu = jnp.mean(x, axis=-1, keepdims=True)
    var = jnp.mean((x - mu) ** 2, axis=-1, keepdims=True)
    return (x - mu) * jax.lax.rsqrt(var + EPS) * gamma + beta


def _enc_drt_kernel(x_ref, gin_ref, bin_ref, g_ref, bt_ref, b0_ref, b1_ref,
                    w0_ref, w1_ref, out_ref, zmax_ref,
                    *, h_chunk, weights_resident):
    """grid = (row tile i [parallel], layer l [arbitrary]).

    out_ref is the VMEM-resident residual state of the current row tile; zmax_ref
    receives the per-(tile, layer) max of post-ReLU activations, stored chunk-wise."""
    l = pl.program_id(1)
    H = zmax_ref.shape[-1]

    # Encoder-input LayerNorm, applied once per row tile before the first block.
    @pl.when(l == 0)
    def _():
        out_ref[...] = _layer_norm(x_ref[...], gin_ref[...], bin_ref[...])

    # Per-block LayerNorm of the residual state.  The block input (residual bypass)
    # stays in out_ref and is re-read there by the per-chunk accumulation below, so
    # no full-tile value is kept live across the unrolled H-chunk loop.
    ln_bf = _layer_norm(out_ref[...], g_ref[l], bt_ref[l]).astype(MXU_DTYPE)
    b0l = b0_ref[l]                                      # (1, H) f32
    b1l = b1_ref[l]                                      # (1, D) f32

    # Fuse dense0(ReLU) and dense1 over H chunks: the (tile_n, H) f32 intermediate is
    # never materialized; dense1 chunks accumulate straight into out_ref.
    for c0 in range(0, H, h_chunk):                      # static, fully unrolled
        if weights_resident:
            w0c = w0_ref[l, :, c0:c0 + h_chunk]          # (D, hc)  MXU dtype
            w1c = w1_ref[l, c0:c0 + h_chunk, :]          # (hc, D)  MXU dtype
        else:
            w0c = w0_ref[0, :, c0:c0 + h_chunk]
            w1c = w1_ref[0, c0:c0 + h_chunk, :]
        h = jnp.dot(ln_bf, w0c, preferred_element_type=jnp.float32)
        h = jnp.maximum(h + b0l[:, c0:c0 + h_chunk], 0.0)          # dense0 + ReLU
        # Per-(tile, layer) activation max.  Padded rows are duplicates of a valid row,
        # so the unmasked max over the tile equals the max over valid rows.
        zmax_ref[0, 0, :, c0:c0 + h_chunk] = jnp.max(h, axis=0, keepdims=True)
        out_ref[...] += jnp.dot(h.astype(MXU_DTYPE), w1c,
                                preferred_element_type=jnp.float32)
    out_ref[...] += b1l                                  # dense1 bias; LayRES residual = out_ref


def _vmem_capacity_bytes():
    try:
        cap = getattr(pltpu.get_tpu_info(), "vmem_capacity_bytes", None)
        if cap:
            return int(cap)
    except Exception:
        pass
    return 64 << 20                # conservative fallback: v7x-sized per-core VMEM


def _pick_config(N, D, H, L, usable_vmem, tile_req=None, resident_req=None):
    """Choose (tile_n, padded_N, weights_resident, h_chunk)."""
    # Largest lane-dense H chunk (<=512 to keep the MXU N-dim wide); full H when small.
    if H <= 512:
        h_chunk = H
    else:
        h_chunk = next((c for c in (512, 256, 128) if H % c == 0), H)

    w_res = L * 2 * D * H * MXU_BYTES       # all-layer weights, single VMEM copy
    w_stream = 2 * 2 * D * H * MXU_BYTES    # one layer's W0+W1, double-buffered
    small = (L * (3 * D + H) + 2 * D) * 4 + 2 * H * 4   # LN params + biases + zmax blk

    def fits(tile, resident):
        w = w_res if resident else w_stream
        tiles = 4 * tile * D * 4                                  # x + out, 2-buffered f32
        act = tile * (2 * D + h_chunk) * 4 + tile * (D + h_chunk) * 2
        return 1.25 * (w + small + tiles + act) <= usable_vmem

    n8 = _round_up(max(N, 1), 8)

    if tile_req is not None:
        assert tile_req % 8 == 0, "tile_n must be a multiple of 8"
        npad = _round_up(N, tile_req)
        if resident_req is None:
            resident = (w_res <= 0.5 * usable_vmem) and fits(tile_req, True)
        else:
            resident = bool(resident_req)
        return tile_req, npad, resident, h_chunk

    candidates = [1024, 768, 512, 384, 256, 192, 128, 96, 64, 32, 16, 8]
    if resident_req is not None:
        resident_opts = [bool(resident_req)]
    else:
        resident_opts = [True, False] if w_res <= 0.5 * usable_vmem else [False]
    for resident in resident_opts:
        for t in candidates:
            if t > n8:
                continue
            npad = _round_up(N, t)
            # Cap padding overhead at ~25% extra rows (padded rows are real compute).
            if npad > max(n8 + 7, int(n8 * 1.25)):
                continue
            if fits(t, resident):
                return t, npad, resident, h_chunk
    return 8, n8, False, h_chunk


def enc_drt_forward(x, params, *, tile_n=None, weights_resident=None):
    """x: (B, S, D) float32.  Returns (out (B, S, D) f32, zeroes (L * dns_scale*D,) f32)."""
    B, S, D = x.shape
    N = B * S
    L, _, H = params["w0"].shape            # H = dns_scale * D

    vmem_cap = _vmem_capacity_bytes()
    # Generation-aware usable scoped-VMEM cap (leave Mosaic internal-scratch headroom):
    # ~56 MiB on 64-MiB parts (v7x), ~105 MiB on 128-MiB parts (v5e/v6e).
    usable_vmem = int(vmem_cap * (0.82 if vmem_cap >= (96 << 20) else 0.875))

    tile_n, Np, resident, h_chunk = _pick_config(
        N, D, H, L, usable_vmem, tile_req=tile_n, resident_req=weights_resident)
    n_tiles = Np // tile_n

    x2 = x.reshape(N, D).astype(jnp.float32)
    pad = Np - N
    if pad:
        # Pad by replicating the last valid row: the forward is purely row-wise, so
        # padded rows produce duplicate activations (zeroes stays exact, no masking)
        # and their outputs are simply sliced off below.
        x2 = jnp.pad(x2, ((0, pad), (0, 0)), mode="edge")

    # Weights feed the MXU in MXU_DTYPE (halves weight DMA + VMEM); LayerNorm, biases,
    # ReLU, residual and all accumulation stay in f32.
    w0 = params["w0"].astype(MXU_DTYPE)
    w1 = params["w1"].astype(MXU_DTYPE)

    def vmem_full():
        # Unblocked operand kept fully VMEM-resident for the whole call (single copy).
        return pl.BlockSpec(memory_space=pltpu.MemorySpace.VMEM)

    if resident:
        # All-layer weights fit comfortably: DMA once, never re-streamed per row tile.
        w0_spec, w1_spec = vmem_full(), vmem_full()
    else:
        w0_spec = pl.BlockSpec((1, D, H), lambda i, l: (l, 0, 0))
        w1_spec = pl.BlockSpec((1, H, D), lambda i, l: (l, 0, 0))

    in_specs = [
        pl.BlockSpec((tile_n, D), lambda i, l: (i, 0)),    # x row tile (read at l==0)
        vmem_full(), vmem_full(),                          # input-LN gamma / beta
        vmem_full(), vmem_full(),                          # per-layer LN gamma / beta
        vmem_full(), vmem_full(),                          # b0 / b1
        w0_spec, w1_spec,
    ]
    out_specs = [
        pl.BlockSpec((tile_n, D), lambda i, l: (i, 0)),          # residual / final out
        pl.BlockSpec((1, 1, 1, H), lambda i, l: (i, l, 0, 0)),   # per-(tile,layer) act max
    ]

    # Advisory cost estimate so XLA schedules the surrounding reshape/slice/reduce
    # sensibly around this long-running custom call.
    weight_traffic = L * 2 * D * H * MXU_BYTES * (1 if resident else n_tiles)
    cost = pl.CostEstimate(
        flops=4 * L * Np * D * H,
        transcendentals=Np * (L + 1),
        bytes_accessed=2 * Np * D * 4 + weight_traffic
                       + (L * (3 * D + H) + 2 * D) * 4 + n_tiles * L * H * 4,
    )

    out2, zmax = pl.pallas_call(
        functools.partial(_enc_drt_kernel, h_chunk=h_chunk, weights_resident=resident),
        grid=(n_tiles, L),
        in_specs=in_specs,
        out_specs=out_specs,
        out_shape=(
            jax.ShapeDtypeStruct((Np, D), jnp.float32),
            jax.ShapeDtypeStruct((n_tiles, L, 1, H), jnp.float32),
        ),
        compiler_params=pltpu.CompilerParams(
            dimension_semantics=("parallel", "arbitrary"),
            vmem_limit_bytes=usable_vmem,
        ),
        cost_estimate=cost,
    )(x2, params["g_in"], params["b_in"], params["g"], params["bt"],
      params["b0"], params["b1"], w0, w1)

    out = out2[:N].reshape(B, S, D)
    # "never activated across ALL rows"  <=>  max of post-ReLU h over all row tiles is 0.
    zeroes = (jnp.max(zmax, axis=0) == 0.0).astype(jnp.float32).reshape(L * H)
    return out, zeroes


def make_params(key, in_width, n_layers, dns_scale=4):
    """Deterministic synthetic parameters matching EncDRT.__init__ shapes (lay_width=in_width)."""
    D, L, H = in_width, n_layers, in_width * dns_scale
    k0, k1 = jax.random.split(key)
    std = 0.02
    return {
        # LayerNorms: torch default init (gamma=1, beta=0)
        "g_in": jnp.ones((1, D), jnp.float32),
        "b_in": jnp.zeros((1, D), jnp.float32),
        "g":    jnp.ones((L, 1, D), jnp.float32),
        "bt":   jnp.zeros((L, 1, D), jnp.float32),
        # Dense weights (deterministic stand-in for my_initializer), biases zero
        "w0": (std * jax.random.normal(k0, (L, D, H))).astype(jnp.float32),
        "b0": jnp.zeros((L, 1, H), jnp.float32),
        "w1": (std * jax.random.normal(k1, (L, H, D))).astype(jnp.float32),
        "b1": jnp.zeros((L, 1, D), jnp.float32),
    }


def ref_forward(x, params):
    """Pure-JAX reference of the same forward (same MXU-dtype weight / f32-acc numerics)."""
    B, S, D = x.shape
    out = _layer_norm(x.reshape(B * S, D), params["g_in"], params["b_in"])
    L = params["w0"].shape[0]
    zs = []
    for l in range(L):
        ln = _layer_norm(out, params["g"][l], params["bt"][l]).astype(MXU_DTYPE)
        h = jnp.dot(ln, params["w0"][l].astype(MXU_DTYPE),
                    preferred_element_type=jnp.float32) + params["b0"][l]
        h = jnp.maximum(h, 0.0)
        zs.append((jnp.max(h, axis=0) == 0.0).astype(jnp.float32))
        out = jnp.dot(h.astype(MXU_DTYPE), params["w1"][l].astype(MXU_DTYPE),
                      preferred_element_type=jnp.float32) + params["b1"][l] + out
    return out.reshape(B, S, D), jnp.concatenate(zs)


if __name__ == "__main__":
    D, L = 32, 6                 # in_width (H = 4*D = 128 lanes), n_layers (EncDRT default)
    key = jax.random.PRNGKey(0)
    kx, kx2, kp = jax.random.split(key, 3)
    params = make_params(kp, in_width=D, n_layers=L, dns_scale=4)

    # Case 1: multi-row-tile ("parallel") path + VMEM-resident weights.
    B, S = 2, 8
    x = jax.random.normal(kx, (B, S, D), jnp.float32)
    out, zeroes = enc_drt_forward(x, params, tile_n=8)
    out = jax.block_until_ready(out)
    zeroes = jax.block_until_ready(zeroes)
    ref_out, ref_z = ref_forward(x, params)
    assert out.shape == (B, S, D) and zeroes.shape == (L * 4 * D,)
    assert jnp.allclose(out, ref_out, rtol=1e-2, atol=1e-2), "out mismatch vs reference (resident)"
    assert jnp.allclose(zeroes, ref_z), "zeroes mismatch vs reference (resident)"

    # Case 2: streamed per-layer weight blocks + edge padding of an awkward row count.
    B2, S2 = 2, 5                # N=10 rows -> padded (edge-replicated) to the row tile
    x2 = jax.random.normal(kx2, (B2, S2, D), jnp.float32)
    out2, zeroes2 = enc_drt_forward(x2, params, weights_resident=False)
    out2 = jax.block_until_ready(out2)
    zeroes2 = jax.block_until_ready(zeroes2)
    ref_out2, ref_z2 = ref_forward(x2, params)
    assert out2.shape == (B2, S2, D) and zeroes2.shape == (L * 4 * D,)
    assert jnp.allclose(out2, ref_out2, rtol=1e-2, atol=1e-2), "out mismatch vs reference (stream)"
    assert jnp.allclose(zeroes2, ref_z2), "zeroes mismatch vs reference (stream)"

    print("KERNEL_OK")
</pallas_src>

<mosaic_0001>
module attributes {stable_mosaic.version = 11 : i64} {
  func.func @_enc_drt_kernel(%arg0: i32, %arg1: i32, %arg2: memref<8x32xf32, #tpu.memory_space<vmem>>, %arg3: memref<1x32xf32, #tpu.memory_space<vmem>>, %arg4: memref<1x32xf32, #tpu.memory_space<vmem>>, %arg5: memref<6x1x32xf32, #tpu.memory_space<vmem>>, %arg6: memref<6x1x32xf32, #tpu.memory_space<vmem>>, %arg7: memref<6x1x128xf32, #tpu.memory_space<vmem>>, %arg8: memref<6x1x32xf32, #tpu.memory_space<vmem>>, %arg9: memref<6x32x128xbf16, #tpu.memory_space<vmem>>, %arg10: memref<6x128x32xbf16, #tpu.memory_space<vmem>>, %arg11: memref<8x32xf32, #tpu.memory_space<vmem>>, %arg12: memref<1x1x1x128xf32, #tpu.memory_space<vmem>>) attributes {dimension_semantics = [#tpu.dimension_semantics<parallel>, #tpu.dimension_semantics<arbitrary>], iteration_bounds = array<i64: 2, 6>, scalar_prefetch = 0 : i64, scratch_operands = 0 : i64, tpu.core_type = #tpu.core_type<tc>, window_params = [{transform_indices = @transform_0, window_bounds = array<i64: 8, 32>}, {pipeline_mode = #tpu.pipeline_mode<synchronous>, transform_indices = @transform_1, window_bounds = array<i64: 1, 32>}, {pipeline_mode = #tpu.pipeline_mode<synchronous>, transform_indices = @transform_2, window_bounds = array<i64: 1, 32>}, {pipeline_mode = #tpu.pipeline_mode<synchronous>, transform_indices = @transform_3, window_bounds = array<i64: 6, 1, 32>}, {pipeline_mode = #tpu.pipeline_mode<synchronous>, transform_indices = @transform_4, window_bounds = array<i64: 6, 1, 32>}, {pipeline_mode = #tpu.pipeline_mode<synchronous>, transform_indices = @transform_5, window_bounds = array<i64: 6, 1, 128>}, {pipeline_mode = #tpu.pipeline_mode<synchronous>, transform_indices = @transform_6, window_bounds = array<i64: 6, 1, 32>}, {pipeline_mode = #tpu.pipeline_mode<synchronous>, transform_indices = @transform_7, window_bounds = array<i64: 6, 32, 128>}, {pipeline_mode = #tpu.pipeline_mode<synchronous>, transform_indices = @transform_8, window_bounds = array<i64: 6, 128, 32>}, {transform_indices = @transform_9, window_bounds = array<i64: 8, 32>}, {transform_indices = @transform_10, window_bounds = array<i64: 1, 1, 1, 128>}]} {
    %c0_i32 = arith.constant 0 : i32
    %0 = arith.cmpi eq, %arg1, %c0_i32 : i32
    %1 = arith.extui %0 : i1 to i32
    %c0_i32_0 = arith.constant 0 : i32
    %2 = arith.cmpi ne, %1, %c0_i32_0 : i32
    scf.if %2 {
      %c0_34 = arith.constant 0 : index
      %c0_35 = arith.constant 0 : index
      %64 = vector.load %arg2[%c0_34, %c0_35] : memref<8x32xf32, #tpu.memory_space<vmem>>, vector<8x32xf32>
      %c0_36 = arith.constant 0 : index
      %c0_37 = arith.constant 0 : index
      %65 = vector.load %arg3[%c0_36, %c0_37] : memref<1x32xf32, #tpu.memory_space<vmem>>, vector<1x32xf32>
      %c0_38 = arith.constant 0 : index
      %c0_39 = arith.constant 0 : index
      %66 = vector.load %arg4[%c0_38, %c0_39] : memref<1x32xf32, #tpu.memory_space<vmem>>, vector<1x32xf32>
      %cst_40 = arith.constant dense<0.000000e+00> : vector<8xf32>
      %67 = vector.multi_reduction <add>, %64, %cst_40 [1] : vector<8x32xf32> to vector<8xf32>
      %68 = vector.shape_cast %67 : vector<8xf32> to vector<8x1xf32>
      %cst_41 = arith.constant 3.200000e+01 : f32
      %69 = vector.broadcast %cst_41 : f32 to vector<8x1xf32>
      %70 = arith.divf %68, %69 : vector<8x1xf32>
      %71 = vector.broadcast %70 : vector<8x1xf32> to vector<8x32xf32>
      %72 = arith.subf %64, %71 : vector<8x32xf32>
      %73 = arith.mulf %72, %72 : vector<8x32xf32>
      %cst_42 = arith.constant dense<0.000000e+00> : vector<8xf32>
      %74 = vector.multi_reduction <add>, %73, %cst_42 [1] : vector<8x32xf32> to vector<8xf32>
      %75 = vector.shape_cast %74 : vector<8xf32> to vector<8x1xf32>
      %cst_43 = arith.constant 3.200000e+01 : f32
      %76 = vector.broadcast %cst_43 : f32 to vector<8x1xf32>
      %77 = arith.divf %75, %76 : vector<8x1xf32>
      %78 = vector.broadcast %70 : vector<8x1xf32> to vector<8x32xf32>
      %79 = arith.subf %64, %78 : vector<8x32xf32>
      %cst_44 = arith.constant 9.99999974E-6 : f32
      %80 = vector.broadcast %cst_44 : f32 to vector<8x1xf32>
      %81 = arith.addf %77, %80 : vector<8x1xf32>
      %82 = math.rsqrt %81 : vector<8x1xf32>
      %83 = vector.broadcast %82 : vector<8x1xf32> to vector<8x32xf32>
      %84 = arith.mulf %79, %83 : vector<8x32xf32>
      %85 = vector.broadcast %65 : vector<1x32xf32> to vector<8x32xf32>
      %86 = arith.mulf %84, %85 : vector<8x32xf32>
      %87 = vector.broadcast %66 : vector<1x32xf32> to vector<8x32xf32>
      %88 = arith.addf %86, %87 : vector<8x32xf32>
      %c0_45 = arith.constant 0 : index
      %c0_46 = arith.constant 0 : index
      %89 = vector.load %arg11[%c0_45, %c0_46] : memref<8x32xf32, #tpu.memory_space<vmem>>, vector<8x32xf32>
      tpu.vector_store %arg11[%c0_45, %c0_46], %88 {strides = array<i32>} : memref<8x32xf32, #tpu.memory_space<vmem>>, vector<8x32xf32>,
    } else {
    }
    %c0 = arith.constant 0 : index
    %c0_1 = arith.constant 0 : index
    %3 = vector.load %arg11[%c0, %c0_1] : memref<8x32xf32, #tpu.memory_space<vmem>>, vector<8x32xf32>
    %4 = arith.index_cast %arg1 : i32 to index
    %c0_2 = arith.constant 0 : index
    %c0_3 = arith.constant 0 : index
    %5 = vector.load %arg5[%4, %c0_2, %c0_3] : memref<6x1x32xf32, #tpu.memory_space<vmem>>, vector<1x1x32xf32>
    %6 = vector.shape_cast %5 : vector<1x1x32xf32> to vector<1x32xf32>
    %7 = arith.index_cast %arg1 : i32 to index
    %c0_4 = arith.constant 0 : index
    %c0_5 = arith.constant 0 : index
    %8 = vector.load %arg6[%7, %c0_4, %c0_5] : memref<6x1x32xf32, #tpu.memory_space<vmem>>, vector<1x1x32xf32>
    %9 = vector.shape_cast %8 : vector<1x1x32xf32> to vector<1x32xf32>
    %cst = arith.constant dense<0.000000e+00> : vector<8xf32>
    %10 = vector.multi_reduction <add>, %3, %cst [1] : vector<8x32xf32> to vector<8xf32>
    %11 = vector.shape_cast %10 : vector<8xf32> to vector<8x1xf32>
    %cst_6 = arith.constant 3.200000e+01 : f32
    %12 = vector.broadcast %cst_6 : f32 to vector<8x1xf32>
    %13 = arith.divf %11, %12 : vector<8x1xf32>
    %14 = vector.broadcast %13 : vector<8x1xf32> to vector<8x32xf32>
    %15 = arith.subf %3, %14 : vector<8x32xf32>
    %16 = arith.mulf %15, %15 : vector<8x32xf32>
    %cst_7 = arith.constant dense<0.000000e+00> : vector<8xf32>
    %17 = vector.multi_reduction <add>, %16, %cst_7 [1] : vector<8x32xf32> to vector<8xf32>
    %18 = vector.shape_cast %17 : vector<8xf32> to vector<8x1xf32>
    %cst_8 = arith.constant 3.200000e+01 : f32
    %19 = vector.broadcast %cst_8 : f32 to vector<8x1xf32>
    %20 = arith.divf %18, %19 : vector<8x1xf32>
    %21 = vector.broadcast %13 : vector<8x1xf32> to vector<8x32xf32>
    %22 = arith.subf %3, %21 : vector<8x32xf32>
    %cst_9 = arith.constant 9.99999974E-6 : f32
    %23 = vector.broadcast %cst_9 : f32 to vector<8x1xf32>
    %24 = arith.addf %20, %23 : vector<8x1xf32>
    %25 = math.rsqrt %24 : vector<8x1xf32>
    %26 = vector.broadcast %25 : vector<8x1xf32> to vector<8x32xf32>
    %27 = arith.mulf %22, %26 : vector<8x32xf32>
    %28 = vector.broadcast %6 : vector<1x32xf32> to vector<8x32xf32>
    %29 = arith.mulf %27, %28 : vector<8x32xf32>
    %30 = vector.broadcast %9 : vector<1x32xf32> to vector<8x32xf32>
    %31 = arith.addf %29, %30 : vector<8x32xf32>
    %32 = arith.truncf %31 : vector<8x32xf32> to vector<8x32xbf16>
    %33 = arith.index_cast %arg1 : i32 to index
    %c0_10 = arith.constant 0 : index
    %c0_11 = arith.constant 0 : index
    %34 = vector.load %arg7[%33, %c0_10, %c0_11] : memref<6x1x128xf32, #tpu.memory_space<vmem>>, vector<1x1x128xf32>
    %35 = vector.shape_cast %34 : vector<1x1x128xf32> to vector<1x128xf32>
    %36 = arith.index_cast %arg1 : i32 to index
    %c0_12 = arith.constant 0 : index
    %c0_13 = arith.constant 0 : index
    %37 = vector.load %arg8[%36, %c0_12, %c0_13] : memref<6x1x32xf32, #tpu.memory_space<vmem>>, vector<1x1x32xf32>
    %38 = vector.shape_cast %37 : vector<1x1x32xf32> to vector<1x32xf32>
    %39 = arith.index_cast %arg1 : i32 to index
    %c0_14 = arith.constant 0 : index
    %c0_15 = arith.constant 0 : index
    %40 = vector.load %arg9[%39, %c0_14, %c0_15] : memref<6x32x128xbf16, #tpu.memory_space<vmem>>, vector<1x32x128xbf16>
    %41 = vector.shape_cast %40 : vector<1x32x128xbf16> to vector<32x128xbf16>
    %42 = arith.index_cast %arg1 : i32 to index
    %c0_16 = arith.constant 0 : index
    %c0_17 = arith.constant 0 : index
    %43 = vector.load %arg10[%42, %c0_16, %c0_17] : memref<6x128x32xbf16, #tpu.memory_space<vmem>>, vector<1x128x32xbf16>
    %44 = vector.shape_cast %43 : vector<1x128x32xbf16> to vector<128x32xbf16>
    %cst_18 = arith.constant dense<0.000000e+00> : vector<8x128xf32>
    %45 = tpu.matmul %32, %41, %cst_18 {dimension_numbers = #tpu.dot_dimension_numbers<[1], [0], [0], [1], [0, 0, 1, 1], [], []>} : vector<8x32xbf16>, vector<32x128xbf16>, vector<8x128xf32> -> vector<8x128xf32>
    %46 = vector.broadcast %35 : vector<1x128xf32> to vector<8x128xf32>
    %47 = arith.addf %45, %46 : vector<8x128xf32>
    %cst_19 = arith.constant 0.000000e+00 : f32
    %48 = vector.broadcast %cst_19 : f32 to vector<8x128xf32>
    %49 = arith.maximumf %47, %48 : vector<8x128xf32>
    %cst_20 = arith.constant dense<0xFF800000> : vector<128xf32>
    %50 = vector.multi_reduction <maximumf>, %49, %cst_20 [0] : vector<8x128xf32> to vector<128xf32>
    %51 = vector.shape_cast %50 : vector<128xf32> to vector<1x128xf32>
    %c0_21 = arith.constant 0 : index
    %c0_22 = arith.constant 0 : index
    %c0_23 = arith.constant 0 : index
    %c0_24 = arith.constant 0 : index
    %52 = vector.load %arg12[%c0_21, %c0_22, %c0_23, %c0_24] : memref<1x1x1x128xf32, #tpu.memory_space<vmem>>, vector<1x1x1x128xf32>
    %53 = vector.shape_cast %52 : vector<1x1x1x128xf32> to vector<1x128xf32>
    %54 = vector.shape_cast %51 : vector<1x128xf32> to vector<1x1x1x128xf32>
    tpu.vector_store %arg12[%c0_21, %c0_22, %c0_23, %c0_24], %54 {strides = array<i32>} : memref<1x1x1x128xf32, #tpu.memory_space<vmem>>, vector<1x1x1x128xf32>,
    %c0_25 = arith.constant 0 : index
    %c0_26 = arith.constant 0 : index
    %55 = vector.load %arg11[%c0_25, %c0_26] : memref<8x32xf32, #tpu.memory_space<vmem>>, vector<8x32xf32>
    %56 = arith.truncf %49 : vector<8x128xf32> to vector<8x128xbf16>
    %cst_27 = arith.constant dense<0.000000e+00> : vector<8x32xf32>
    %57 = tpu.matmul %56, %44, %cst_27 {dimension_numbers = #tpu.dot_dimension_numbers<[1], [0], [0], [1], [0, 0, 1, 1], [], []>} : vector<8x128xbf16>, vector<128x32xbf16>, vector<8x32xf32> -> vector<8x32xf32>
    %58 = arith.addf %55, %57 : vector<8x32xf32>
    %c0_28 = arith.constant 0 : index
    %c0_29 = arith.constant 0 : index
    %59 = vector.load %arg11[%c0_28, %c0_29] : memref<8x32xf32, #tpu.memory_space<vmem>>, vector<8x32xf32>
    tpu.vector_store %arg11[%c0_28, %c0_29], %58 {strides = array<i32>} : memref<8x32xf32, #tpu.memory_space<vmem>>, vector<8x32xf32>,
    %c0_30 = arith.constant 0 : index
    %c0_31 = arith.constant 0 : index
    %60 = vector.load %arg11[%c0_30, %c0_31] : memref<8x32xf32, #tpu.memory_space<vmem>>, vector<8x32xf32>
    %61 = vector.broadcast %38 : vector<1x32xf32> to vector<8x32xf32>
    %62 = arith.addf %60, %61 : vector<8x32xf32>
    %c0_32 = arith.constant 0 : index
    %c0_33 = arith.constant 0 : index
    %63 = vector.load %arg11[%c0_32, %c0_33] : memref<8x32xf32, #tpu.memory_space<vmem>>, vector<8x32xf32>
    tpu.vector_store %arg11[%c0_32, %c0_33], %62 {strides = array<i32>} : memref<8x32xf32, #tpu.memory_space<vmem>>, vector<8x32xf32>,
    return
  }
  func.func @transform_0(%arg0: i32, %arg1: i32) -> (i32, i32) {
    %c0_i32 = arith.constant 0 : i32
    %c0_i32_0 = arith.constant 0 : i32
    return %arg0, %c0_i32 : i32, i32
  }
  func.func @transform_1(%arg0: i32, %arg1: i32) -> (i32, i32) {
    %c0_i32 = arith.constant 0 : i32
    %c0_i32_0 = arith.constant 0 : i32
    %c0_i32_1 = arith.constant 0 : i32
    return %c0_i32, %c0_i32_0 : i32, i32
  }
  func.func @transform_2(%arg0: i32, %arg1: i32) -> (i32, i32) {
    %c0_i32 = arith.constant 0 : i32
    %c0_i32_0 = arith.constant 0 : i32
    %c0_i32_1 = arith.constant 0 : i32
    return %c0_i32, %c0_i32_0 : i32, i32
  }
  func.func @transform_3(%arg0: i32, %arg1: i32) -> (i32, i32, i32) {
    %c0_i32 = arith.constant 0 : i32
    %c0_i32_0 = arith.constant 0 : i32
    %c0_i32_1 = arith.constant 0 : i32
    %c0_i32_2 = arith.constant 0 : i32
    return %c0_i32, %c0_i32_0, %c0_i32_1 : i32, i32, i32
  }
  func.func @transform_4(%arg0: i32, %arg1: i32) -> (i32, i32, i32) {
    %c0_i32 = arith.constant 0 : i32
    %c0_i32_0 = arith.constant 0 : i32
    %c0_i32_1 = arith.constant 0 : i32
    %c0_i32_2 = arith.constant 0 : i32
    return %c0_i32, %c0_i32_0, %c0_i32_1 : i32, i32, i32
  }
  func.func @transform_5(%arg0: i32, %arg1: i32) -> (i32, i32, i32) {
    %c0_i32 = arith.constant 0 : i32
    %c0_i32_0 = arith.constant 0 : i32
    %c0_i32_1 = arith.constant 0 : i32
    %c0_i32_2 = arith.constant 0 : i32
    return %c0_i32, %c0_i32_0, %c0_i32_1 : i32, i32, i32
  }
  func.func @transform_6(%arg0: i32, %arg1: i32) -> (i32, i32, i32) {
    %c0_i32 = arith.constant 0 : i32
    %c0_i32_0 = arith.constant 0 : i32
    %c0_i32_1 = arith.constant 0 : i32
    %c0_i32_2 = arith.constant 0 : i32
    return %c0_i32, %c0_i32_0, %c0_i32_1 : i32, i32, i32
  }
  func.func @transform_7(%arg0: i32, %arg1: i32) -> (i32, i32, i32) {
    %c0_i32 = arith.constant 0 : i32
    %c0_i32_0 = arith.constant 0 : i32
    %c0_i32_1 = arith.constant 0 : i32
    %c0_i32_2 = arith.constant 0 : i32
    return %c0_i32, %c0_i32_0, %c0_i32_1 : i32, i32, i32
  }
  func.func @transform_8(%arg0: i32, %arg1: i32) -> (i32, i32, i32) {
    %c0_i32 = arith.constant 0 : i32
    %c0_i32_0 = arith.constant 0 : i32
    %c0_i32_1 = arith.constant 0 : i32
    %c0_i32_2 = arith.constant 0 : i32
    return %c0_i32, %c0_i32_0, %c0_i32_1 : i32, i32, i32
  }
  func.func @transform_9(%arg0: i32, %arg1: i32) -> (i32, i32) {
    %c0_i32 = arith.constant 0 : i32
    %c0_i32_0 = arith.constant 0 : i32
    return %arg0, %c0_i32 : i32, i32
  }
  func.func @transform_10(%arg0: i32, %arg1: i32) -> (i32, i32, i32, i32) {
    %c0_i32 = arith.constant 0 : i32
    %c0_i32_0 = arith.constant 0 : i32
    %c0_i32_1 = arith.constant 0 : i32
    return %arg0, %arg1, %c0_i32, %c0_i32_0 : i32, i32, i32, i32
  }
}

</mosaic_0001>

<bundles_post_ra>
// kernel: tpu_custom_call.1
= control target key start
LH: loop header
LB: loop body
LE: loop exit
PB: predicated region body
PF: predicated region fallthrough
CT: control target
= control target key end

     0   :  { %s1489_s0 = inlined_call_operand.vmem [shape: f32[16,32], index: 0, kind: input, shape index: {}]   ;;  %s1490_s1 = inlined_call_operand.vmem [shape: f32[1,32], index: 1, kind: input, shape index: {}]   ;;  %s1491_s2 = inlined_call_operand.vmem [shape: f32[1,32], index: 2, kind: input, shape index: {}]   ;;  %s1492_s3 = inlined_call_operand.vmem [shape: f32[6,1,32], index: 3, kind: input, shape index: {}]   ;;  %s1493_s4 = inlined_call_operand.vmem [shape: f32[6,1,32], index: 4, kind: input, shape index: {}]   ;;  %s1494_s5 = inlined_call_operand.vmem [shape: f32[6,1,128], index: 5, kind: input, shape index: {}]   ;;  %s1495_s6 = inlined_call_operand.vmem [shape: f32[6,1,32], index: 6, kind: input, shape index: {}]   ;;  %s1496_s7 = inlined_call_operand.vmem [shape: bf16[6,32,128], index: 7, kind: input, shape index: {}]   ;;  %s1497_s8 = inlined_call_operand.vmem [shape: bf16[6,128,32], index: 8, kind: input, shape index: {}]   ;;  %s1498_s9 = inlined_call_operand.hbm [shape: f32[16,32], index: 9, kind: output, shape index: {0}]   ;;  %s1499_s10 = inlined_call_operand.hbm [shape: f32[2,6,1,128], index: 10, kind: output, shape index: {1}]  }
   0x1   :  { %1510 = sst [smem:[#allocation15_spill]] %s1489_s0 }
   0x2   :  { %1511 = sst [smem:[#allocation16_spill]] %s1490_s1 }
   0x3   :  { %1512 = sst [smem:[#allocation17_spill]] %s1491_s2 }
   0x4   :  { %1513 = sst [smem:[#allocation18_spill]] %s1492_s3 }
   0x5   :  { %1514 = sst [smem:[#allocation19_spill]] %s1493_s4 }
   0x6   :  { %1515 = sst [smem:[#allocation20_spill]] %s1495_s6 }
   0x7   :  { %1516 = sst [smem:[#allocation21_spill]] %s1498_s9 }
   0x8   :  { %16 = vsyncpa [#allocation3], 0 }
   0x9   :  { %18 = vsyncpa [#allocation3 + $0x1], 0 }
   0xa   :  { %19 = vsyncpa [#allocation5], 0 }
   0xb   :  { %21 = vsyncpa [#allocation5 + $0x1], 0  ;;  %s1197_s13 = smov 0   ;;  %s1199_s14 = smov 0  }
   0xc   :  { %s1201_s15 = smov 0   ;;  %s1203_s16 = smov 0  }
   0xd   :  { %s1205_s17 = smov 0   ;;  %s1207_s18 = smov 0  }
   0xe   :  { %s1209_s19 = smov 0   ;;  %s1211_s20 = smov 0  }
   0xf   :  { %s1213_s21 = smov 0   ;;  %s1215_s22 = smov 0  }
  0x10   :  { %s1217_s23 = smov 0  }
  0x11 LB: > { %1517 = sst [smem:[#allocation8_spill]] %s1108_s16  ;;  %s793_s24 = sadd.s32 4294967295, %s1136_s23   ;;  %s1136_s23 = sphi %s1217_s23, %s27_s23   ;;  %s1132_s22 = sphi %s1215_s22, %s1546_s22   ;;  %s1128_s21 = sphi %s1213_s21, %s1553_s21   ;;  %s1124_s20 = sphi %s1211_s20, %s1544_s20   ;;  %s1120_s19 = sphi %s1209_s19, %s1543_s19   ;;  %s1116_s18 = sphi %s1207_s18, %s1552_s18   ;;  %s1112_s17 = sphi %s1205_s17, %s1551_s17   ;;  %s1108_s16 = sphi %s1203_s16, %s1550_s16   ;;  %s1104_s15 = sphi %s1201_s15, %s1549_s15   ;;  %s1100_s14 = sphi %s1199_s14, %s1548_s14   ;;  %s1096_s13 = sphi %s1197_s13, %s1547_s13  }
  0x12   : > { %1518 = sst [smem:[#allocation9_spill]] %s1128_s21  ;;  %s794_s25 = sadd.s32 4294967294, %s1136_s23  }
  0x13   : > { %1519 = sst [smem:[#allocation10_spill]] %s1132_s22  ;;  %s36_s26 = sadd.s32 1, %s1128_s21 }
  0x14   : > { %s39_s27 = sadd.s32 1, %s1132_s22  ;;  %p37_p0 = scmp.ge.s32.totalorder %s36_s26, 6 }
  0x15   : > { %s240_s28 = sadd.s32 1, %s1116_s18  ;;  %p250_p1 = scmp.ne.s32.totalorder %s1116_s18, %s1112_s17 }
  0x16   : > { %p1259_p2 = scmp.eq.s32.totalorder %s793_s24, 11  ;;  %s1555_s26 = smov (%p37_p0, %s36_s26), 0 }
  0x17   : > { %1521 = sst [smem:[#allocation11_spill]] %s1555_s26  ;;  %s1557_s27 = smov (!%p37_p0, %s39_s27), %s1132_s22 }
  0x18   : > { %p1268_p3 = por %p1259_p2, %p250_p1  ;;  %p256_p4 = scmp.ne.s32.totalorder %s1112_s17, %s1108_s16 }
  0x19   : > { %p41_p5 = scmp.ge.s32.totalorder %s1557_s27, 2  ;;  %p1274_p6 = scmp.eq.s32.totalorder %s794_s25, 11 }
  0x1a   : > { %s1522_s30 = scalar_select %p1268_p3, 1, 0 }
  0x1b   : > { %s264_s12 = ssub.s32 %s1128_s21, %s1555_s26  ;;  %s268_s24 = sadd.s32 1, %s1104_s15 }
  0x1c   : > { %1523 = sst [smem:[#allocation12_spill]] %s1522_s30  ;;  %s1559_s27 = smov (%p41_p5, %s1557_s27), 0 }
  0x1d   : > { %1525 = sst [smem:[#allocation13_spill]] %s1559_s27  ;;  %p1285_p7 = por %p1274_p6, %p256_p4 }
  0x1e   : > { %p278_p8 = scmp.ne.s32.totalorder %s1104_s15, %s1100_s14  ;;  %s237_s16 = ssub.s32 %s1132_s22, %s1559_s27 }
  0x1f   : > { %p284_p9 = scmp.ne.s32.totalorder %s1100_s14, %s1096_s13  ;;  %p238_p10 = scmp.eq.s32.totalorder %s237_s16, 0 }
  0x20   : > { %s265_s25 = sor.u32 %s264_s12, %s237_s16  ;;  %p1297_p12 = por %p278_p8, %p1259_p2 }
  0x21   : > { %p266_p11 = scmp.eq.s32.totalorder %s265_s25, 0  ;;  %p1309_p13 = por %p284_p9, %p1274_p6 }
  0x22   : > { %s1302_s26 = scalar_select %p238_p10, %s1116_s18, %s240_s28  }
  0x23   : > { %s1305_s21 = scalar_select %p266_p11, %s1104_s15, %s268_s24  }
  0x24   : > { %1528 = sst [smem:[#allocation14_spill]] %s1302_s26  ;;  %p797_p0 = scmp.ge.s32.totalorder %s1136_s23, 1 }
  0x25   : > { %p334_p1 = scmp.lt.s32.totalorder %s1136_s23, 13 }
  0x27   : > { %p335_p4 = pnand %p797_p0, %p334_p1 }
  0x28   : > { %s1508_s16 = sand.u32 (!%p335_p4), 1, %s1112_s17   ;;  %s1509_s28 = sand.u32 (!%p335_p4), 1, %s1100_s14  }
  0x29   : > { %338 = sbr.rel (%p335_p4) target bundleno = 1145 (0x479), region = 56  ;;  %s798_s29 = sshll.u32 (!%p335_p4), %s1508_s16, 3 }
  0x2a   : > { %p375_p2 = scmp.lt.s32.totalorder (!%p335_p4), %s1124_s20, 1  ;;  %s1530_s0 = sld [smem:[#allocation15_spill]] (!%p335_p4) }
  0x2b   : > { %s1324_s22 = scalar_lea.vmem (!%p335_p4), [#allocation2], %s798_s29  ;;  %s1328_s26 = scalar_lea.vmem (!%p335_p4), [#allocation4], %s1509_s28 }
  0x2c   : > { %p800_p5 = scmp.ne.s32.totalorder (!%p335_p4), %s1120_s19, 0 }
  0x30   : > { %s376_s11 = scalar_select %p375_p2, %s1124_s20, 1 }
  0x31   : > { %383 = sbr.rel (%p800_p5) target bundleno = 367 (0x16f), region = 60  ;;  %vm387_vm0 = vcmask (!%p800_p5), 261120   ;;  %s1531_s1 = sld [smem:[#allocation16_spill]] (!%p800_p5) }
  0x32   : > { %s799_s12 = sshll.u32 %s376_s11, 3  ;;  %s1532_s2 = sld [smem:[#allocation17_spill]] (!%p800_p5) }
  0x33   : > { %s378_s27 = scalar_lea.vmem %s1530_s0, %s799_s12 }
  0x34   : > { %v384_v0 = vld [vmem:[%s378_s27] sm:$0xff] (!%p800_p5) }
  0x35   : > { %v388_v1 = vsel (!%p800_p5), %vm387_vm0, %v384_v0, 0.0 }
  0x36   : > { %389 = vadd.xlane.f32.xlu0 (!%p800_p5), %v388_v1 }
  0x37   : > { %v801_v11 = vld [vmem:[%s1531_s1] ss:$0 sm:$0xff] (!%p800_p5) }
  0x38   : > { %v802_v13 = vld [vmem:[%s1532_s2] ss:$0 sm:$0xff] }
  0xc3   : > { %v390_v2 = vpop.xlane.xlu0 %389 }
  0xc4   : > { %v392_v3 = vmul.f32 0.03125, %v390_v2 }
  0xc6   : > { %v393_v4 = vsub.f32 %v384_v0, %v392_v3 }
  0xc8   : > { %v394_v5 = vmul.f32 %v393_v4, %v393_v4 }
  0xca   : > { %v395_v6 = vsel %vm387_vm0, %v394_v5, 0.0 }
  0xcb   : > { %396 = vadd.xlane.f32.xlu0 %v395_v6 }
 0x158   : > { %v397_v7 = vpop.xlane.xlu0 %396 }
 0x159   : > { %v398_v8 = vmul.f32 0.03125, %v397_v7 }
 0x15b   : > { %v399_v9 = vadd.f32 1e-05, %v398_v8 }
 0x15d   : > { %972 = vrsqrt.f32 %v399_v9 }
 0x167   : > { %v973_v10 = vpop.eup %972 }
 0x168   : > { %v401_v12 = vmul.f32 %v973_v10, %v393_v4 }
 0x16a   : > { %v408_v14 = vmul.f32 %v801_v11, %v401_v12 }
 0x16c   : > { %v415_v15 = vadd.f32 %v802_v13, %v408_v14 }
 0x16e   : > { %416 = vst.msk [vmem:[%s1324_s22] sm:$0xff] %vm387_vm0, %v415_v15 }
 0x16f PF: > { %vm422_vm1 = vcmask 261120   ;;  %s827_s24 = sshll.u32 %s1120_s19, 4  ;;  %v1138_v24 = vmov 0.0   ;;  %vm1139_vm2 = vmmov 0   ;;  %s828_s27 = sshll.u32 %s1120_s19, 6 }
 0x170   : > { %s458_s11 = scalar_lea.vmem %s1496_s7, %s827_s24  ;;  %841 = vmatprep.subr.bf16.mxu0 %v1138_v24  ;;  %849 = vmatprep.subr.bf16.mxu1 %v1138_v24  ;;  %s1356_s28 = scalar_lea.vmem %s1497_s8, %s828_s27 }
 0x171   : > { %v974_v23 = vld [vmem:[%s458_s11] sm:$0xff]   ;;  %v975_v25 = vld [vmem:[%s458_s11 + $0x8] sm:$0xff]   ;;  %845 = vmatprep.mubr.msk.bf16.mxu0 %vm1139_vm2, %v1138_v24  ;;  %865 = vmatprep.mubr.msk.bf16.mxu1 %vm1139_vm2, %v1138_v24  ;;  %v978_v28 = vld [vmem:[%s1356_s28 + $0x10] sm:$0xff]   ;;  %s1533_s3 = sld [smem:[#allocation18_spill]]  ;;  %s1534_s4 = sld [smem:[#allocation19_spill]] }
 0x172   : > { %842 = vmatpush3.bf16.msra.mxu0 %v974_v23  ;;  %v976_v26 = vld [vmem:[%s1356_s28] sm:$0xff]   ;;  %v977_v27 = vld [vmem:[%s1356_s28 + $0x8] sm:$0xff]   ;;  %v979_v29 = vld [vmem:[%s1356_s28 + $0x18] sm:$0xff]   ;;  %s452_s24 = scalar_lea.vmem %s1494_s5, %s1120_s19  ;;  %s685_s11 = sshll.u32 %s1328_s26, 4  ;;  %s686_s11 = int_to_ptr.vmem [resolvable:$true] %s685_s11 }
 0x173   : > { %843 = vmatprep.subr.bf16.mxu0 %v1138_v24  ;;  %850 = vmatpush3.bf16.msra.mxu1 %v976_v26  ;;  %v980_v30 = vld [vmem:[%s1356_s28 + $0x20] sm:$0xff]   ;;  %v981_v31 = vld [vmem:[%s1356_s28 + $0x28] sm:$0xff]   ;;  %v982_v42 = vld [vmem:[%s1356_s28 + $0x30] sm:$0xff]   ;;  %s986_s1 = scalar_lea.vmem %s686_s11, 16  ;;  %s1140_s2 = smov [#allocation4]  }
 0x174   : > { %851 = vmatprep.subr.bf16.mxu1 %v1138_v24  ;;  %v983_v43 = vld [vmem:[%s1356_s28 + $0x38] sm:$0xff]   ;;  %v809_v44 = vld [vmem:[%s452_s24] ss:$0 sm:$0xff]  ;;  %s869_s28 = smul.u32 6, %s1124_s20  ;;  %s1535_s24 = sand.u32 1, %s1100_s14  }
 0x175   : > { %v1342_v16 = vld [vmem:[%s1324_s22] sm:$0xff]  ;;  %s658_s0 = scalar_lea.sflag [#allocation5], %s1535_s24  ;;  %p987_p6 = scmp.ne.s32.totalorder %s686_s11, %s986_s1 }
 0x176   : > { %v423_v17 = vsel %vm422_vm1, %v1342_v16, 0.0  ;;  %844 = vmatpush3.bf16.msra.mxu0 %v975_v25 }
 0x177   : > { %424 = vadd.xlane.f32.xlu0 %v423_v17  ;;  %852 = vmatpush3.bf16.msra.mxu1 %v977_v27  ;;  %s418_s25 = scalar_lea.vmem %s1533_s3, %s1120_s19  ;;  %s420_s27 = scalar_lea.vmem %s1534_s4, %s1120_s19 }
 0x178   : > { %853 = vmatprep.subr.bf16.mxu1 %v1138_v24  ;;  %v803_v36 = vld [vmem:[%s418_s25] ss:$0 sm:$0xff]  ;;  %s681_s25 = sadd.s32 %s1120_s19, %s869_s28  ;;  %p988_p8 = pnand %p987_p6, %p1297_p12 }
 0x179   : > { %v804_v38 = vld [vmem:[%s420_s27] ss:$0 sm:$0xff]  ;;  %s824_s29 = sshll.u32 %s681_s25, 4  ;;  %s990_s3 = sshll.u32 %s1140_s2, 4  ;;  %s991_s3 = int_to_ptr.vmem [resolvable:$false] %s990_s3 }
 0x17a   : > { %s1386_s16 = scalar_lea.hbm %s1499_s10, %s824_s29  ;;  %p989_p9 = pneg %p988_p8 }
 0x17b   : > { %854 = vmatpush3.bf16.msra.mxu1 %v978_v28  ;;  %s992_s4 = scalar_lea.vmem %s991_s3, 32  ;;  %p993_p10 = scmp.lt.s32.totalorder %s686_s11, %s991_s3 }
 0x17c   : > { %855 = vmatprep.subr.bf16.mxu1 %v1138_v24  ;;  %p994_p11 = scmp.lt.s32.totalorder %s992_s4, %s986_s1 }
 0x17e   : > { %p995_p0 = por %p994_p11, %p993_p10 }
 0x17f   : > { %856 = vmatpush3.bf16.msra.mxu1 %v979_v29 }
 0x180   : > { %857 = vmatprep.subr.bf16.mxu1 %v1138_v24  ;;  %p996_p1 = pnand %p995_p0, %p989_p9 }
 0x183   : > { %858 = vmatpush3.bf16.msra.mxu1 %v980_v30 }
 0x184   : > { %859 = vmatprep.subr.bf16.mxu1 %v1138_v24 }
 0x187   : > { %860 = vmatpush3.bf16.msra.mxu1 %v981_v31 }
 0x188   : > { %861 = vmatprep.subr.bf16.mxu1 %v1138_v24 }
 0x18b   : > { %862 = vmatpush3.bf16.msra.mxu1 %v982_v42 }
 0x18c   : > { %863 = vmatprep.subr.bf16.mxu1 %v1138_v24 }
 0x18f   : > { %864 = vmatpush3.bf16.msra.mxu1 %v983_v43 }
 0x204   : > { %v425_v18 = vpop.xlane.xlu0 %424 }
 0x205   : > { %v427_v19 = vmul.f32 0.03125, %v425_v18 }
 0x207   : > { %v428_v20 = vsub.f32 %v1342_v16, %v427_v19 }
 0x209   : > { %v429_v21 = vmul.f32 %v428_v20, %v428_v20 }
 0x20b   : > { %v430_v22 = vsel %vm422_vm1, %v429_v21, 0.0 }
 0x20c   : > { %431 = vadd.xlane.f32.xlu0 %v430_v22 }
 0x299   : > { %v432_v32 = vpop.xlane.xlu0 %431 }
 0x29a   : > { %v433_v33 = vmul.f32 0.03125, %v432_v32 }
 0x29c   : > { %v434_v34 = vadd.f32 1e-05, %v433_v33 }
 0x29e   : > { %984 = vrsqrt.f32 %v434_v34 }
 0x2a8   : > { %v985_v35 = vpop.eup %984 }
 0x2a9   : > { %v436_v37 = vmul.f32 %v985_v35, %v428_v20 }
 0x2ab   : > { %v443_v39 = vmul.f32 %v803_v36, %v436_v37 }
 0x2ad   : > { %v450_v40 = vadd.f32 %v804_v38, %v443_v39 }
 0x2af   : > { %v451_v41 = vpack.c.bf16 %v450_v40, %v450_v40 }
 0x2b1   : > { %846 = vmatmul.mubr.msk.bf16.vlgmr.msra.gmra.mrb[0].mxu0 %vm422_vm1, %v451_v41 }
 0x384   : > { %v537_v45 = vpop.f32.mrb[0].mxu0 }
 0x385   : > { %v538_v46 = vadd.f32 %v809_v44, %v537_v45  ;;  %v847_v47 = vpop.f32.mrb[1].mxu0 }
 0x386   : > { %v540_v48 = vpop.f32.mrb[2].mxu0 }
 0x387   : > { %v543_v49 = vmax.f32 %v538_v46, 0.0  ;;  %v848_v50 = vpop.f32.mrb[3].mxu0 }
 0x389   : > { %v544_v51 = vrot.slane %v543_v49, 4  ;;  %v552_v52 = vpack.c.bf16 %v543_v49, %v543_v49 }
 0x38b   : > { %v545_v53 = vmax.f32 %v543_v49, %v544_v51  ;;  %866 = vmatmul.mubr.bf16.vlgmr.msra.gmra.mrb[0].mxu1 %v552_v52 }
 0x38d   : > { %v546_v54 = vrot.slane %v545_v53, 2 }
 0x38f   : > { %v547_v55 = vmax.f32 %v545_v53, %v546_v54 }
 0x391   : > { %v548_v56 = vrot.slane %v547_v55, 1 }
 0x393   : > { %v549_v57 = vmax.f32 %v547_v55, %v548_v56 }
 0x395   : > { %550 = vst [vmem:[%s1328_s26] sm:$0x1] %v549_v57 }
 0x396   : > { %999 = shalt.err (!%p996_p1)
}
 0x397   : > { %s1000_s26 = scalar_lea.hbm %s1386_s16, 16  ;;  %s1004_s2 = scalar_lea.hbm %s1499_s10, 192 }
 0x398   : > { %p1001_p4 = scmp.ne.s32.totalorder %s1386_s16, %s1000_s26  ;;  %p1005_p6 = scmp.lt.u32.totalorder %s1386_s16, %s1499_s10 }
 0x399   : > { %p1006_p8 = scmp.lt.u32.totalorder %s1004_s2, %s1000_s26  ;;  %p1008_p10 = scmp.lt.u32.totalorder %s1000_s26, %s1386_s16 }
 0x39a   : > { %p1002_p2 = pnand %p1001_p4, %p1297_p12 }
 0x39b   : > { %p1007_p9 = por %p1006_p8, %p1005_p6 }
 0x39c   : > { %p1003_p5 = pneg %p1002_p2 }
 0x39d   : > { %p1009_p11 = por %p1008_p10, %p1007_p9 }
 0x39f   : > { %p1010_p0 = pnand %p1009_p11, %p1003_p5 }
 0x3a1   : > { %1013 = shalt.err (!%p1010_p0)
}
 0x3a2   : > { %871 = dma.vmem_to_hbm [thread:$0]  (%p1297_p12), %s686_s11, 16, %s1386_s16, %s658_s0  }
 0x3a3   : > { %s1537_s27 = sld [smem:[#allocation20_spill]]  ;;  %s823_s24 = sshll.u32 %s1124_s20, 7 }
 0x3a4   : > { %s670_s26 = sshll.u32 %s1324_s22, 4  ;;  %s1538_s16 = sld [smem:[#allocation21_spill]]  ;;  %s1422_s26 = int_to_ptr.vmem [resolvable:$true] %s670_s26 }
 0x3a5   : > { %s1540_s2 = sand.u32 1, %s1112_s17   ;;  %s1141_s20 = smov [#allocation2]  }
 0x3a6   : > { %s653_s29 = scalar_lea.sflag [#allocation3], %s1540_s2  ;;  %s1018_s3 = sshll.u32 %s1141_s20, 4  ;;  %s1019_s3 = int_to_ptr.vmem [resolvable:$false] %s1018_s3 }
 0x3a7   : > { %s1020_s4 = scalar_lea.vmem %s1019_s3, 256  ;;  %p1021_p2 = scmp.lt.s32.totalorder %s1422_s26, %s1019_s3 }
 0x3a9   : > { %s454_s12 = scalar_lea.vmem %s1537_s27, %s1120_s19  ;;  %s1014_s19 = scalar_lea.vmem %s1422_s26, 128 }
 0x3aa   : > { %v821_v63 = vld [vmem:[%s454_s12] ss:$0 sm:$0xff]  ;;  %s1539_s28 = smov %s1538_s16  ;;  %s1420_s25 = scalar_lea.hbm %s1538_s16, %s823_s24 }
 0x3ab   : > { %p1015_p12 = scmp.ne.s32.totalorder %s1422_s26, %s1014_s19  ;;  %p1022_p5 = scmp.lt.s32.totalorder %s1020_s4, %s1014_s19 }
 0x3ad   : > { %p1016_p1 = pnand %p1015_p12, %p1268_p3  ;;  %p1023_p6 = por %p1022_p5, %p1021_p2 }
 0x3af   : > { %p1017_p4 = pneg %p1016_p1 }
 0x3b1   : > { %p1024_p8 = pnand %p1023_p6, %p1017_p4 }
 0x45e   : > { %v635_v58 = vpop.f32.mrb[0].mxu1 }
 0x45f   : > { %v641_v59 = vadd.f32 %v635_v58, %v1342_v16  ;;  %v867_v60 = vpop.f32.mrb[1].mxu1 }
 0x460   : > { %v638_v61 = vpop.f32.mrb[2].mxu1 }
 0x461   : > { %642 = vst.msk [vmem:[%s1324_s22] sm:$0xff] %vm422_vm1, %v641_v59  ;;  %v868_v62 = vpop.f32.mrb[3].mxu1 }
 0x468   : > { %v643_v0 = vld [vmem:[%s1324_s22] sm:$0xff] }
 0x469   : > { %v650_v1 = vadd.f32 %v821_v63, %v643_v0 }
 0x46b   : > { %651 = vst.msk [vmem:[%s1324_s22] sm:$0xff] %vm422_vm1, %v650_v1 }
 0x46c   : > { %1027 = shalt.err (!%p1024_p8)
}
 0x46d   : > { %s1028_s22 = scalar_lea.hbm %s1420_s25, 128  ;;  %s1032_s12 = scalar_lea.hbm %s1539_s28, 256 }
 0x46e   : > { %p1029_p9 = scmp.ne.s32.totalorder %s1420_s25, %s1028_s22  ;;  %p1033_p0 = scmp.lt.u32.totalorder %s1420_s25, %s1539_s28 }
 0x46f   : > { %p1034_p12 = scmp.lt.u32.totalorder %s1032_s12, %s1028_s22  ;;  %p1036_p4 = scmp.lt.u32.totalorder %s1028_s22, %s1420_s25 }
 0x470   : > { %p1030_p10 = pnand %p1029_p9, %p1268_p3 }
 0x471   : > { %p1035_p1 = por %p1034_p12, %p1033_p0 }
 0x472   : > { %p1031_p11 = pneg %p1030_p10 }
 0x473   : > { %p1037_p2 = por %p1036_p4, %p1035_p1 }
 0x475   : > { %p1038_p5 = pnand %p1037_p2, %p1031_p11 }
 0x477   : > { %1041 = shalt.err (!%p1038_p5)
}
 0x478   : > { %870 = dma.vmem_to_hbm [thread:$0]  (%p1268_p3), %s1422_s26, 128, %s1420_s25, %s653_s29  }
 0x479 PF: > { %s1541_s11 = sld [smem:[#allocation8_spill]]  ;;  %p881_p6 = scmp.ge.s32.totalorder %s1136_s23, 2 }
 0x47b   : > { %p875_p8 = pnand %p881_p6, %p1285_p7 }
 0x47f   : > { %s697_s16 = sand.u32 1, %s1541_s11  }
 0x480   : > { %s698_s2 = scalar_lea.sflag [#allocation3], %s697_s16 }
 0x481   : > { %1087 = dma.done.wait (!%p875_p8), %s698_s2, 128  }
 0x482   : > { %1089 = vsyncadd (!%p875_p8), %s698_s2, 4294967168  ;;  %s706_s19 = sand.u32 1, %s1096_s13   ;;  %p878_p9 = pnand %p881_p6, %p1309_p13 }
 0x483   : > { %s707_s1 = scalar_lea.sflag [#allocation5], %s706_s19 }
 0x484   : > { %1091 = dma.done.wait (!%p878_p9), %s707_s1, 16  }
 0x485   : > { %1093 = vsyncadd (!%p878_p9), %s707_s1, 4294967280  ;;  %s27_s23 = sadd.s32 1, %s1136_s23   ;;  %s1542_s9 = sld [smem:[#allocation14_spill]] }
 0x486   : > { %p24_p3 = scmp.ge.s32.totalorder %s27_s23, 14   ;;  %s1543_s19 = sld [smem:[#allocation9_spill]] }
 0x487   : > { %s1544_s20 = sld [smem:[#allocation10_spill]]  ;;  %s1545_s26 = sld [smem:[#allocation11_spill]] }
 0x488   : > { %s1546_s22 = sld [smem:[#allocation13_spill]]  ;;  %s1547_s13 = smov %s1100_s14 }
 0x489   : > { %s1548_s14 = smov %s1104_s15  ;;  %s1549_s15 = smov %s1305_s21 }
 0x48a   : > { %s1550_s16 = smov %s1112_s17  ;;  %s1551_s17 = smov %s1116_s18 }
 0x48b   : > { %s1552_s18 = smov %s1542_s9  ;;  %26 = sbr.rel (!%p24_p3) target bundleno = 17 (0x11), region = 118 }
 0x48d   : > { %s1553_s21 = smov %s1545_s26 }
 0x492   :  { %711 = vsyncpa [#allocation3], 1 }
 0x493   :  { %713 = vsyncpa [#allocation3 + $0x1], 1 }
 0x494   :  { %714 = vsyncpa [#allocation5], 1 }
 0x495   :  { %716 = vsyncpa [#allocation5 + $0x1], 1 }

</bundles_post_ra>
